<compile_context>
chip_gen: v7x
topology: tpu7x:2x2x1
jax: 0.10.0
libtpu: 0.0.40
codegen_flags: <defaults>
</compile_context>

<pallas_src>
import functools

import jax
import jax.numpy as jnp
from jax.experimental import pallas as pl
from jax.experimental.pallas import tpu as pltpu


def _round_up(n, m):
    return ((n + m - 1) // m) * m


def _tpu_info():
    try:
        return pltpu.get_tpu_info()
    except Exception:
        return None


def _int_attr(obj, name):
    try:
        v = int(getattr(obj, name))
        return v if v > 0 else None
    except (AttributeError, TypeError, ValueError):
        return None


def _vmem_capacity_bytes():
    info = _tpu_info()
    if info is not None:
        v = _int_attr(info, "vmem_capacity_bytes")
        if v is not None:
            return v
    return 64 * 1024 * 1024  # conservative (v7x-sized) fallback


def _num_tensorcores():
    """Best-effort TensorCores-per-chip query; defaults to 1 (v5e/v6e)."""
    info = _tpu_info()
    if info is not None:
        for name in ("tensorcores_per_chip", "num_tensorcores"):
            v = _int_attr(info, name)
            if v is not None:
                return v
    return 1


def _pick_tile_n(n, c, x_itemsize, t_itemsize, *, budget_bytes, cap_rows=4096):
    """Largest row tile (multiple of 8) whose working set fits the byte budget.

    Working set per row: double-buffered input blocks for both operands plus
    roughly 4 f32 (tile_n, C) temporaries inside the kernel body (x / t
    upcasts, exp(x - m), t * x).
    """
    per_row = 2 * c * (x_itemsize + t_itemsize) + 4 * c * 4
    tile = budget_bytes // max(per_row, 1)
    tile = min(tile, cap_rows, _round_up(max(n, 1), 8))
    tile = max(8, (tile // 8) * 8)
    return int(tile)


def _soft_ce_kernel(x_ref, t_ref, out_ref, *, tile_n, tiles_per_split, total_n,
                    needs_mask):
    i = pl.program_id(1)  # reduction axis over row tiles (per core split)

    @pl.when(i == 0)
    def _():
        out_ref[...] = jnp.zeros_like(out_ref)

    x = x_ref[...].astype(jnp.float32)          # (tile_n, C)
    t = t_ref[...].astype(jnp.float32)          # (tile_n, C)

    # Numerically stable per-row logsumexp.
    m = jnp.max(x, axis=-1, keepdims=True)                    # (tile_n, 1)
    s = jnp.sum(jnp.exp(x - m), axis=-1, keepdims=True)       # (tile_n, 1)
    lse = m + jnp.log(s)                                      # (tile_n, 1)

    # sum_c(-t_c * log_softmax(x)_c) == lse * sum_c(t_c) - sum_c(t_c * x_c)
    t_sum = jnp.sum(t, axis=-1, keepdims=True)                # (tile_n, 1)
    tx_sum = jnp.sum(t * x, axis=-1, keepdims=True)           # (tile_n, 1)
    loss = lse * t_sum - tx_sum                               # (tile_n, 1)

    if needs_mask:
        # Mask rows whose *logical* index is >= N.  Applied after the row
        # reduction so any NaN/garbage in padded tail rows is killed here.
        c = pl.program_id(0)
        row0 = (c * tiles_per_split + i) * tile_n
        rows = row0 + jax.lax.broadcasted_iota(jnp.int32, (tile_n, 1), 0)
        loss = jnp.where(rows < total_n, loss, 0.0)

    # Fold rows into 8 sublanes (cheap: operates on a (tile_n, 1) column only).
    out_ref[...] += loss.reshape(tile_n // 8, 8, 1).sum(axis=0)


def soft_target_cross_entropy(x, target, *, tile_n=None, num_splits=None):
    """x, target: (N, C). Returns scalar mean soft-target cross entropy (f32)."""
    N, C = x.shape
    assert target.shape == (N, C)

    x_isz = jnp.dtype(x.dtype).itemsize
    t_isz = jnp.dtype(target.dtype).itemsize

    # Generation-keyed VMEM budgets.
    vmem_cap = _vmem_capacity_bytes()
    if vmem_cap >= 100 * 1024 * 1024:          # v5e / v6e: 128 MiB physical VMEM
        vmem_limit = 64 * 1024 * 1024
        tile_budget = 40 * 1024 * 1024
    else:                                      # v7x: 64 MiB VMEM per TensorCore
        vmem_limit = 48 * 1024 * 1024
        tile_budget = 28 * 1024 * 1024

    if tile_n is None:
        tile_n = _pick_tile_n(N, C, x_isz, t_isz, budget_bytes=tile_budget)
    assert tile_n % 8 == 0

    tiles_total = -(-N // tile_n)

    # Split across TensorCores only where it buys a second core (v7x) and only
    # when there is more than one tile to split.
    if num_splits is None:
        num_splits = _num_tensorcores()
    num_splits = max(1, min(int(num_splits), tiles_total))

    tiles_per_split = -(-tiles_total // num_splits)
    has_dups = num_splits * tiles_per_split != tiles_total
    needs_mask = (N % tile_n != 0) or has_dups

    def in_map(c, i):
        blk = c * tiles_per_split + i
        if has_dups:
            # Clamp duplicated trailing blocks of the last split in-bounds;
            # their contribution is zeroed by the in-kernel row mask.
            blk = jnp.minimum(blk, tiles_total - 1)
        return (blk, 0)

    if num_splits > 1:
        dim_sem = (getattr(pltpu, "CORE_PARALLEL", "parallel"),
                   getattr(pltpu, "ARBITRARY", "arbitrary"))
    else:
        dim_sem = ("arbitrary", "arbitrary")

    kernel = functools.partial(
        _soft_ce_kernel,
        tile_n=tile_n,
        tiles_per_split=tiles_per_split,
        total_n=N,
        needs_mask=needs_mask,
    )

    in_bytes = x.size * x_isz + target.size * t_isz
    cost = pl.CostEstimate(
        flops=5 * N * C,
        transcendentals=N * C + N,
        bytes_accessed=in_bytes + num_splits * 8 * 4,
    )

    partials = pl.pallas_call(
        kernel,
        out_shape=jax.ShapeDtypeStruct((num_splits * 8, 1), jnp.float32),
        grid_spec=pltpu.PrefetchScalarGridSpec(
            num_scalar_prefetch=0,
            grid=(num_splits, tiles_per_split),
            in_specs=[
                pl.BlockSpec((tile_n, C), in_map),
                pl.BlockSpec((tile_n, C), in_map),
            ],
            out_specs=pl.BlockSpec((8, 1), lambda c, i: (c, 0)),
        ),
        compiler_params=pltpu.CompilerParams(
            dimension_semantics=dim_sem,
            vmem_limit_bytes=vmem_limit,
        ),
        cost_estimate=cost,
    )(x, target)

    return jnp.sum(partials) / jnp.float32(N)


def _reference(x, target):
    logp = jax.nn.log_softmax(x.astype(jnp.float32), axis=-1)
    return jnp.mean(jnp.sum(-target.astype(jnp.float32) * logp, axis=-1))


if __name__ == "__main__":
    key = jax.random.PRNGKey(0)
    k1, k2, k3, k4 = jax.random.split(key, 4)

    # Test 1: small f32, single tile (16 samples, 128 classes).
    N, C = 16, 128
    x = jax.random.normal(k1, (N, C), dtype=jnp.float32)
    target = jax.nn.softmax(jax.random.normal(k2, (N, C), dtype=jnp.float32), axis=-1)
    loss = jax.block_until_ready(soft_target_cross_entropy(x, target))
    ref = jax.block_until_ready(_reference(x, target))
    assert jnp.allclose(loss, ref, rtol=1e-5, atol=1e-6), (loss, ref)

    # Test 2: ragged batch (N not a multiple of tile_n), mixed dtypes
    # (bf16 logits, f32 soft targets), multiple tiles — exercises tail
    # masking + multi-step accumulation.
    N2, C2 = 50, 96
    x2 = jax.random.normal(k3, (N2, C2), dtype=jnp.bfloat16)
    target2 = jax.nn.softmax(
        jax.random.normal(k4, (N2, C2), dtype=jnp.float32), axis=-1
    )
    loss2 = jax.block_until_ready(soft_target_cross_entropy(x2, target2, tile_n=16))
    ref2 = jax.block_until_ready(_reference(x2, target2))
    assert jnp.allclose(loss2, ref2, rtol=1e-4, atol=1e-5), (loss2, ref2)

    print("KERNEL_OK")
</pallas_src>

<mosaic_0001>
module attributes {stable_mosaic.version = 11 : i64} {
  func.func @_soft_ce_kernel(%arg0: i32, %arg1: i32, %arg2: memref<16x128xf32, #tpu.memory_space<vmem>>, %arg3: memref<16x128xf32, #tpu.memory_space<vmem>>, %arg4: memref<8x1xf32, #tpu.memory_space<vmem>>) attributes {dimension_semantics = [#tpu.dimension_semantics<arbitrary>, #tpu.dimension_semantics<arbitrary>], iteration_bounds = array<i64: 1, 1>, scalar_prefetch = 0 : i64, scratch_operands = 0 : i64, tpu.core_type = #tpu.core_type<tc>, window_params = [{transform_indices = @transform_0, window_bounds = array<i64: 16, 128>}, {transform_indices = @transform_1, window_bounds = array<i64: 16, 128>}, {transform_indices = @transform_2, window_bounds = array<i64: 8, 1>}]} {
    %c0_i32 = arith.constant 0 : i32
    %0 = arith.cmpi eq, %arg1, %c0_i32 : i32
    %1 = arith.extui %0 : i1 to i32
    %c0_i32_0 = arith.constant 0 : i32
    %2 = arith.cmpi ne, %1, %c0_i32_0 : i32
    scf.if %2 {
      %cst_12 = arith.constant 0.000000e+00 : f32
      %26 = vector.broadcast %cst_12 : f32 to vector<8x1xf32>
      %c0_13 = arith.constant 0 : index
      %c0_14 = arith.constant 0 : index
      %27 = vector.load %arg4[%c0_13, %c0_14] : memref<8x1xf32, #tpu.memory_space<vmem>>, vector<8x1xf32>
      tpu.vector_store %arg4[%c0_13, %c0_14], %26 {strides = array<i32>} : memref<8x1xf32, #tpu.memory_space<vmem>>, vector<8x1xf32>,
    } else {
    }
    %c0 = arith.constant 0 : index
    %c0_1 = arith.constant 0 : index
    %3 = vector.load %arg2[%c0, %c0_1] : memref<16x128xf32, #tpu.memory_space<vmem>>, vector<16x128xf32>
    %c0_2 = arith.constant 0 : index
    %c0_3 = arith.constant 0 : index
    %4 = vector.load %arg3[%c0_2, %c0_3] : memref<16x128xf32, #tpu.memory_space<vmem>>, vector<16x128xf32>
    %cst = arith.constant dense<0xFF800000> : vector<16xf32>
    %5 = vector.multi_reduction <maximumf>, %3, %cst [1] : vector<16x128xf32> to vector<16xf32>
    %6 = vector.shape_cast %5 : vector<16xf32> to vector<16x1xf32>
    %7 = vector.broadcast %6 : vector<16x1xf32> to vector<16x128xf32>
    %8 = arith.subf %3, %7 : vector<16x128xf32>
    %9 = math.exp %8 : vector<16x128xf32>
    %cst_4 = arith.constant dense<0.000000e+00> : vector<16xf32>
    %10 = vector.multi_reduction <add>, %9, %cst_4 [1] : vector<16x128xf32> to vector<16xf32>
    %11 = vector.shape_cast %10 : vector<16xf32> to vector<16x1xf32>
    %12 = math.log %11 : vector<16x1xf32>
    %13 = arith.addf %6, %12 : vector<16x1xf32>
    %cst_5 = arith.constant dense<0.000000e+00> : vector<16xf32>
    %14 = vector.multi_reduction <add>, %4, %cst_5 [1] : vector<16x128xf32> to vector<16xf32>
    %15 = vector.shape_cast %14 : vector<16xf32> to vector<16x1xf32>
    %16 = arith.mulf %4, %3 : vector<16x128xf32>
    %cst_6 = arith.constant dense<0.000000e+00> : vector<16xf32>
    %17 = vector.multi_reduction <add>, %16, %cst_6 [1] : vector<16x128xf32> to vector<16xf32>
    %18 = vector.shape_cast %17 : vector<16xf32> to vector<16x1xf32>
    %19 = arith.mulf %13, %15 : vector<16x1xf32>
    %20 = arith.subf %19, %18 : vector<16x1xf32>
    %c0_7 = arith.constant 0 : index
    %c0_8 = arith.constant 0 : index
    %21 = vector.load %arg4[%c0_7, %c0_8] : memref<8x1xf32, #tpu.memory_space<vmem>>, vector<8x1xf32>
    %22 = vector.shape_cast %20 : vector<16x1xf32> to vector<2x8x1xf32>
    %cst_9 = arith.constant dense<0.000000e+00> : vector<8x1xf32>
    %23 = vector.multi_reduction <add>, %22, %cst_9 [0] : vector<2x8x1xf32> to vector<8x1xf32>
    %24 = arith.addf %21, %23 : vector<8x1xf32>
    %c0_10 = arith.constant 0 : index
    %c0_11 = arith.constant 0 : index
    %25 = vector.load %arg4[%c0_10, %c0_11] : memref<8x1xf32, #tpu.memory_space<vmem>>, vector<8x1xf32>
    tpu.vector_store %arg4[%c0_10, %c0_11], %24 {strides = array<i32>} : memref<8x1xf32, #tpu.memory_space<vmem>>, vector<8x1xf32>,
    return
  }
  func.func @transform_0(%arg0: i32, %arg1: i32) -> (i32, i32) {
    %c1_i32 = arith.constant 1 : i32
    %0 = arith.muli %arg0, %c1_i32 : i32
    %1 = arith.addi %0, %arg1 : i32
    %c0_i32 = arith.constant 0 : i32
    %c0_i32_0 = arith.constant 0 : i32
    return %1, %c0_i32 : i32, i32
  }
  func.func @transform_1(%arg0: i32, %arg1: i32) -> (i32, i32) {
    %c1_i32 = arith.constant 1 : i32
    %0 = arith.muli %arg0, %c1_i32 : i32
    %1 = arith.addi %0, %arg1 : i32
    %c0_i32 = arith.constant 0 : i32
    %c0_i32_0 = arith.constant 0 : i32
    return %1, %c0_i32 : i32, i32
  }
  func.func @transform_2(%arg0: i32, %arg1: i32) -> (i32, i32) {
    %c0_i32 = arith.constant 0 : i32
    %c0_i32_0 = arith.constant 0 : i32
    return %arg0, %c0_i32 : i32, i32
  }
}

</mosaic_0001>

<bundles_post_ra>
// kernel: tpu_custom_call.1
= control target key start
LH: loop header
LB: loop body
LE: loop exit
PB: predicated region body
PF: predicated region fallthrough
CT: control target
= control target key end

     0   :  { %7 = vsyncpa [#allocation3], 0  ;;  %s222_s0 = inlined_call_operand.hbm [shape: f32[16,128], index: 0, kind: input, shape index: {}]   ;;  %s223_s1 = inlined_call_operand.hbm [shape: f32[16,128], index: 1, kind: input, shape index: {}]   ;;  %s224_s2 = inlined_call_operand.vmem [shape: f32[8,1], index: 2, kind: output, shape index: {}]  }
   0x1   :  { %8 = vsyncpa [#allocation5], 0  ;;  %s167_s9 = smov [#allocation2]   ;;  %s119_s13 = scalar_lea.hbm %s222_s0, 256 }
   0x2   :  { %s18_s10 = sshll.u32 %s167_s9, 4  ;;  %p120_p0 = scmp.ne.s32.totalorder %s222_s0, %s119_s13  ;;  %s19_s10 = int_to_ptr.vmem [resolvable:$true] %s18_s10 }
   0x3   :  { %p123_p1 = scmp.lt.u32.totalorder %s119_s13, %s222_s0 }
   0x5   :  { %p125_p2 = pnand %p123_p1, %p120_p0 }
   0x7   :  { %128 = shalt.err (!%p125_p2)
}
   0x8   :  { %s129_s18 = scalar_lea.vmem %s19_s10, 256  ;;  %p134_p4 = scmp.lt.s32.totalorder %s19_s10, %s19_s10 }
   0x9   :  { %p130_p3 = scmp.ne.s32.totalorder %s19_s10, %s129_s18  ;;  %p135_p5 = scmp.lt.s32.totalorder %s129_s18, %s129_s18 }
   0xb   :  { %p136_p6 = por %p135_p5, %p134_p4 }
   0xd   :  { %p137_p7 = pnand %p136_p6, %p130_p3 }
   0xf   :  { %140 = shalt.err (!%p137_p7)
}
  0x10   :  { %s168_s19 = smov 128   ;;  %s169_s20 = smov 8  }
  0x11   :  { %24 = dma.hbm_to_vmem [thread:$0]  %s222_s0, 256, %s19_s10, [#allocation3], %s168_s19, %s168_s19, %s169_s20  }
  0x12   :  { %s170_s23 = smov [#allocation4]   ;;  %s141_s27 = scalar_lea.hbm %s223_s1, 256 }
  0x13   :  { %s34_s24 = sshll.u32 %s170_s23, 4  ;;  %p142_p8 = scmp.ne.s32.totalorder %s223_s1, %s141_s27  ;;  %s35_s24 = int_to_ptr.vmem [resolvable:$true] %s34_s24 }
  0x14   :  { %p145_p9 = scmp.lt.u32.totalorder %s141_s27, %s223_s1 }
  0x16   :  { %p147_p10 = pnand %p145_p9, %p142_p8 }
  0x18   :  { %150 = shalt.err (!%p147_p10)
}
  0x19   :  { %s151_s4 = scalar_lea.vmem %s35_s24, 256  ;;  %p156_p12 = scmp.lt.s32.totalorder %s35_s24, %s35_s24 }
  0x1a   :  { %p152_p11 = scmp.ne.s32.totalorder %s35_s24, %s151_s4  ;;  %p157_p13 = scmp.lt.s32.totalorder %s151_s4, %s151_s4 }
  0x1c   :  { %p158_p0 = por %p157_p13, %p156_p12 }
  0x1e   :  { %p159_p1 = pnand %p158_p0, %p152_p11 }
  0x20   :  { %162 = shalt.err (!%p159_p1)
}
  0x21   :  { %40 = dma.hbm_to_vmem [thread:$0]  %s223_s1, 256, %s35_s24, [#allocation5], %s168_s19, %s168_s19, %s169_s20  }
  0x22   :  { %163 = dma.done.wait [#allocation3], 256  }
  0x23   :  { %164 = vsyncadd [#allocation3], 4294967040 }
  0x24   :  { %165 = dma.done.wait [#allocation5], 256  }
  0x25   :  { %166 = vsyncadd [#allocation5], 4294967040  ;;  %vm55_vm0 = vcmask 7168   ;;  %v171_v0 = vmov 0.0   ;;  %v57_v1 = vld [vmem:[#allocation2] sm:$0xff]  ;;  %v58_v2 = vld [vmem:[#allocation2 + $0x8] sm:$0xff] }
  0x26   :  { %56 = vst.msk [vmem:[%s224_s2] sm:$0xff] %vm55_vm0, %v171_v0  ;;  %61 = vmax.xlane.f32.xlu0 %v57_v1  ;;  %v59_v3 = vld [vmem:[#allocation4] sm:$0xff]  ;;  %v60_v13 = vld [vmem:[#allocation4 + $0x8] sm:$0xff] }
  0x27   :  { %v85_v4 = vmul.f32 %v59_v3, %v57_v1  ;;  %v86_v14 = vmul.f32 %v60_v13, %v58_v2 }
  0x2a   :  { %63 = vmax.xlane.f32.xlu0 %v58_v2 }
  0x2d   :  { %v95_v31 = vld [vmem:[%s224_s2] sm:$0xff] }
  0x2e   :  { %81 = vadd.xlane.f32.xlu0 %v59_v3 }
  0x32   :  { %87 = vadd.xlane.f32.xlu0 %v85_v4 }
  0xb3   :  { %v62_v5 = vpop.xlane.xlu0 %61 }
  0xb4   :  { %v65_v6 = vsub.f32 %v57_v1, %v62_v5 }
  0xb6   :  { %v67_v7 = vmul.f32 1.442695, %v65_v6 }
  0xb7   :  { %v64_v8 = vpop.xlane.xlu0 %63 }
  0xb8   :  { %v66_v9 = vsub.f32 %v58_v2, %v64_v8  ;;  %111 = vpow2.f32 %v67_v7 }
  0xba   :  { %v69_v10 = vmul.f32 1.442695, %v66_v9 }
  0xbb   :  { %v82_v19 = vpop.xlane.xlu0 %81 }
  0xbc   :  { %113 = vpow2.f32 %v69_v10 }
  0xbf   :  { %v88_v26 = vpop.xlane.xlu0 %87 }
  0xc2   :  { %v112_v11 = vpop.eup %111 }
  0xc3   :  { %71 = vadd.xlane.f32.xlu1 %v112_v11 }
  0xc6   :  { %v114_v12 = vpop.eup %113 }
  0xc7   :  { %73 = vadd.xlane.f32.xlu1 %v114_v12 }
  0xcb   :  { %83 = vadd.xlane.f32.xlu1 %v60_v13 }
  0xcf   :  { %89 = vadd.xlane.f32.xlu1 %v86_v14 }
 0x150   :  { %v72_v15 = vpop.xlane.xlu1 %71 }
 0x151   :  { %115 = vlog2.f32 %v72_v15 }
 0x154   :  { %v74_v16 = vpop.xlane.xlu1 %73 }
 0x155   :  { %117 = vlog2.f32 %v74_v16 }
 0x158   :  { %v84_v20 = vpop.xlane.xlu1 %83 }
 0x15b   :  { %v116_v17 = vpop.eup %115 }
 0x15c   :  { %v76_v18 = vmul.f32 0.6931472, %v116_v17  ;;  %v90_v27 = vpop.xlane.xlu1 %89 }
 0x15e   :  { %v79_v21 = vadd.f32 %v76_v18, %v62_v5 }
 0x15f   :  { %v118_v22 = vpop.eup %117 }
 0x160   :  { %v78_v23 = vmul.f32 0.6931472, %v118_v22  ;;  %v91_v24 = vmul.f32 %v82_v19, %v79_v21 }
 0x162   :  { %v80_v25 = vadd.f32 %v78_v23, %v64_v8  ;;  %v93_v29 = vsub.f32 %v91_v24, %v88_v26 }
 0x164   :  { %v92_v28 = vmul.f32 %v84_v20, %v80_v25 }
 0x166   :  { %v94_v30 = vsub.f32 %v92_v28, %v90_v27 }
 0x168   :  { %v96_v32 = vadd.f32 %v94_v30, %v93_v29 }
 0x16a   :  { %v97_v33 = vadd.f32 %v96_v32, %v95_v31 }
 0x16c   :  { %99 = vst.msk [vmem:[%s224_s2] sm:$0xff] %vm55_vm0, %v97_v33 }
 0x16d   :  { %104 = vsyncpa [#allocation3], 1 }
 0x16e   :  { %105 = vsyncpa [#allocation5], 1 }

</bundles_post_ra>
